<compile_context>
chip_gen: v6e
topology: v6e:2x2x1
jax: 0.10.0
libtpu: 0.0.40
codegen_flags: <defaults>
</compile_context>

<pallas_src>
import functools

import numpy as np
import jax
import jax.numpy as jnp
from jax.experimental import pallas as pl
from jax.experimental.pallas import tpu as pltpu

_EPS = 1e-8
_VMEM_LIMIT = 48 * 1024 * 1024      # safe on v5e/v6e (128 MiB phys) and v7x (64 MiB phys)
_BLOCK_BUDGET = 4 * 1024 * 1024     # ~4 MiB per input block (x2 buffers x3 arrays << limit)
_M_MAX_BYTES = 4 * 1024 * 1024      # use fused M = P @ U only while it stays VMEM-resident


# ----------------------------------------------------------------------------- kernels
def _multiplicative_kernel(hr_ref, lr_ref, out_ref):
    # blocks: (rows, H*W) with the full patch on the lane axis
    hr = hr_ref[...]
    lr = lr_ref[...]
    avg = jnp.mean(hr, axis=-1, keepdims=True)              # (rows, 1) per-patch mean
    inv = pl.reciprocal(avg + _EPS, approx=False)           # one reciprocal per row (EUP)
    out_ref[...] = hr * (lr * inv)


def _softmax_kernel(hr_ref, lr_ref, out_ref, *, exp_factor):
    hr = hr_ref[...]
    lr = lr_ref[...]
    z = exp_factor * hr
    m = jnp.max(z, axis=-1, keepdims=True)                  # XLU row-max (free slot)
    e = jnp.exp(z - m)                                      # EUP
    s = jnp.sum(e, axis=-1, keepdims=True)
    # mathematically identical to exp(z) * lr / (sum(exp(z)) + eps), but overflow-safe
    denom = s + _EPS * jnp.exp(-m)
    out_ref[...] = e * (lr * pl.reciprocal(denom, approx=False))


def _additive_kernel_fused(hr_ref, lr_ref, u_ref, m_ref, out_ref):
    # out = hr + lr @ U - hr @ M   on (tile_bc, H*W) lane-dense blocks (one big MXU GEMM)
    hr = hr_ref[...]
    lr = lr_ref[...]
    up = jnp.dot(lr, u_ref[...], preferred_element_type=jnp.float32)
    pooled_up = jnp.dot(hr, m_ref[...], preferred_element_type=jnp.float32)
    out_ref[...] = (hr + up - pooled_up).astype(out_ref.dtype)


def _additive_kernel_factored(hr_ref, lr_ref, p_ref, u_ref, out_ref):
    # out = hr + (lr - hr @ P) @ U   (fallback when M = P @ U would be too large for VMEM)
    hr = hr_ref[...]
    lr = lr_ref[...]
    pooled = jnp.dot(hr, p_ref[...], preferred_element_type=jnp.float32)
    delta_up = jnp.dot(lr - pooled, u_ref[...], preferred_element_type=jnp.float32)
    out_ref[...] = (hr + delta_up).astype(out_ref.dtype)


# ----------------------------------------------------------------------------- host-side operators
def _adaptive_pool_matrix(in_size, out_size):
    """(out_size, in_size) matrix reproducing torch adaptive_avg_pool1d windows."""
    m = np.zeros((out_size, in_size), np.float32)
    for i in range(out_size):
        start = (i * in_size) // out_size
        end = -((-(i + 1) * in_size) // out_size)  # ceil((i+1)*in/out)
        m[i, start:end] = 1.0 / float(end - start)
    return m


def _nearest_matrix(out_size, in_size):
    """(out_size, in_size) one-hot matrix reproducing F.interpolate(mode='nearest')."""
    m = np.zeros((out_size, in_size), np.float32)
    for i in range(out_size):
        src = (i * in_size) // out_size
        m[i, src] = 1.0
    return m


@functools.lru_cache(maxsize=None)
def _kron_operators(H, W, h, w):
    """Flattened pool / upsample operators (cached per shape, built once on host).

    hr_flat @ P  == vec(adaptive_avg_pool2d(hr, (h, w)))       P: (H*W, h*w)
    delta_flat @ U == vec(interpolate(delta, (H, W), nearest))  U: (h*w, H*W)
    M = P @ U                                                   M: (H*W, H*W)
    """
    p_row = _adaptive_pool_matrix(H, h)          # (h, H)
    p_col = _adaptive_pool_matrix(W, w)          # (w, W)
    u_row = _nearest_matrix(H, h)                # (H, h)
    u_col = _nearest_matrix(W, w)                # (W, w)
    P = np.kron(p_row.T, p_col.T).astype(np.float32)   # (H*W, h*w)
    U = np.kron(u_row.T, u_col.T).astype(np.float32)   # (h*w, H*W)
    M = (P @ U).astype(np.float32)                      # (H*W, H*W)
    return P, U, M


# ----------------------------------------------------------------------------- tiling helpers
def _pick_rows(R, N, budget_bytes=_BLOCK_BUDGET):
    """Row-block size for an (R, N) f32 array.

    Multiple of 8 (or all of R when R < 8), sized toward ~budget_bytes per block
    so the mem-bound kernels approach the HBM roofline, and split into >=2 grid
    steps for large R so both v7x TensorCores get work.  The last block may be
    partial (Pallas masks the out-of-range stores)."""
    if R <= 8:
        return R
    budget_rows = max(8, (budget_bytes // max(N * 4, 1)) // 8 * 8)
    max_rows = (R // 8) * 8
    rows = min(budget_rows, max_rows)
    if R >= 32 and rows * 2 > R:                 # leave >=2 steps on the parallel axis
        rows = max(8, ((R // 2) // 8) * 8)
    return rows


# ----------------------------------------------------------------------------- pallas wrappers
def _rowwise_call(kernel, hr_flat, lr_flat):
    """Run a per-patch-reduction kernel over (B*C, H*W) rows."""
    R, N = hr_flat.shape
    rows = _pick_rows(R, N)
    grid = (pl.cdiv(R, rows),)
    return pl.pallas_call(
        kernel,
        out_shape=jax.ShapeDtypeStruct((R, N), hr_flat.dtype),
        grid_spec=pltpu.PrefetchScalarGridSpec(
            num_scalar_prefetch=0,
            grid=grid,
            in_specs=[
                pl.BlockSpec((rows, N), lambda i: (i, 0)),
                pl.BlockSpec((rows, N), lambda i: (i, 0)),
            ],
            out_specs=pl.BlockSpec((rows, N), lambda i: (i, 0)),
        ),
        compiler_params=pltpu.CompilerParams(
            dimension_semantics=("parallel",),
            vmem_limit_bytes=_VMEM_LIMIT,
        ),
    )(hr_flat, lr_flat)


def _additive_call(hr, lr):
    B, C, H, W = hr.shape
    h, w = int(lr.shape[-2]), int(lr.shape[-1])
    BC, HW, hw = B * C, H * W, h * w

    hr_flat = hr.reshape(BC, HW)
    lr_flat = lr.reshape(BC, hw)

    P_np, U_np, M_np = _kron_operators(H, W, h, w)
    tile_bc = _pick_rows(BC, HW)
    grid = (pl.cdiv(BC, tile_bc),)

    if M_np.nbytes <= _M_MAX_BYTES:
        kernel = _additive_kernel_fused
        ops = (jnp.asarray(U_np), jnp.asarray(M_np))
        op_specs = [
            pl.BlockSpec((hw, HW), lambda i: (0, 0)),
            pl.BlockSpec((HW, HW), lambda i: (0, 0)),
        ]
    else:
        kernel = _additive_kernel_factored
        ops = (jnp.asarray(P_np), jnp.asarray(U_np))
        op_specs = [
            pl.BlockSpec((HW, hw), lambda i: (0, 0)),
            pl.BlockSpec((hw, HW), lambda i: (0, 0)),
        ]

    out = pl.pallas_call(
        kernel,
        out_shape=jax.ShapeDtypeStruct((BC, HW), hr.dtype),
        grid_spec=pltpu.PrefetchScalarGridSpec(
            num_scalar_prefetch=0,
            grid=grid,
            in_specs=[
                pl.BlockSpec((tile_bc, HW), lambda i: (i, 0)),
                pl.BlockSpec((tile_bc, hw), lambda i: (i, 0)),
                *op_specs,
            ],
            out_specs=pl.BlockSpec((tile_bc, HW), lambda i: (i, 0)),
        ),
        compiler_params=pltpu.CompilerParams(
            dimension_semantics=("parallel",),
            vmem_limit_bytes=_VMEM_LIMIT,
        ),
    )(hr_flat, lr_flat, *ops)
    return out.reshape(B, C, H, W)


# ----------------------------------------------------------------------------- forward (jitted)
@functools.partial(jax.jit, static_argnames=("grid_shape", "constraint_type", "exp_factor"))
def _forward(hr_graph, lr_graph, *, grid_shape, constraint_type, exp_factor):
    if hr_graph.ndim == 3:
        batch_size, _, features = hr_graph.shape
        H, W = grid_shape
        # raw reshape, matching torch .view semantics
        hr_grid = hr_graph.reshape(batch_size, features, H, W)
        lr_grid = lr_graph.reshape(batch_size, features, H, W)
    elif hr_graph.ndim == 4:
        batch_size, features, H, W = hr_graph.shape
        if (H, W) != grid_shape:
            raise ValueError(f"Expected spatial dimensions {grid_shape}, got {(H, W)}")
        hr_grid = hr_graph
        lr_grid = lr_graph
    else:
        raise ValueError("Input tensor must be either 3D (graph) or 4D (grid).")

    B, C, Hh, Ww = hr_grid.shape
    if constraint_type == "additive":
        result = _additive_call(hr_grid, lr_grid)
    elif constraint_type == "multiplicative":
        out = _rowwise_call(
            _multiplicative_kernel,
            hr_grid.reshape(B * C, Hh * Ww),
            lr_grid.reshape(B * C, Hh * Ww),
        )
        result = out.reshape(B, C, Hh, Ww)
    elif constraint_type == "softmax":
        kern = functools.partial(_softmax_kernel, exp_factor=exp_factor)
        out = _rowwise_call(
            kern,
            hr_grid.reshape(B * C, Hh * Ww),
            lr_grid.reshape(B * C, Hh * Ww),
        )
        result = out.reshape(B, C, Hh, Ww)
    else:
        raise ValueError(f"Unknown constraint type: {constraint_type}")

    # raw view (torch .view semantics), NOT a channels-last transpose
    return result.reshape(batch_size, -1, features)


# ----------------------------------------------------------------------------- module
class PhysicalConstraintLayer:
    """JAX/Pallas port of graph_weather PhysicalConstraintLayer (forward only)."""

    def __init__(self, grid_shape, constraint_type="additive", exp_factor=1.0):
        self.grid_shape = tuple(int(g) for g in grid_shape)
        self.constraint_type = constraint_type
        self.exp_factor = float(exp_factor)

    def __call__(self, hr_graph, lr_graph):
        return _forward(
            hr_graph,
            lr_graph,
            grid_shape=self.grid_shape,
            constraint_type=self.constraint_type,
            exp_factor=self.exp_factor,
        )


# ----------------------------------------------------------------------------- references
def _ref_additive(hr, lr):
    B, C, H, W = hr.shape
    h, w = lr.shape[-2:]
    s1, s2 = H // h, W // w
    pooled = hr.reshape(B, C, h, s1, w, s2).mean(axis=(3, 5))
    delta = lr - pooled
    delta_up = jnp.repeat(jnp.repeat(delta, s1, axis=2), s2, axis=3)
    return hr + delta_up


def _ref_multiplicative(hr, lr):
    avg = hr.mean(axis=(-2, -1), keepdims=True)
    return hr * (lr / (avg + _EPS))


def _ref_softmax(hr, lr, exp_factor):
    B, C, H, W = hr.shape
    e = jnp.exp(exp_factor * hr.reshape(B, C, -1))
    s = e.sum(axis=-1, keepdims=True)
    return (e * (lr.reshape(B, C, -1) / (s + _EPS))).reshape(B, C, H, W)


# ----------------------------------------------------------------------------- main
if __name__ == "__main__":
    key = jax.random.PRNGKey(0)
    k1, k2, k3 = jax.random.split(key, 3)

    B, C, H, W = 2, 4, 16, 16
    h, w = 4, 4
    hr = jax.random.normal(k1, (B, C, H, W), jnp.float32)
    lr_small = jax.random.normal(k2, (B, C, h, w), jnp.float32)
    lr_full = jax.random.normal(k3, (B, C, H, W), jnp.float32)

    ok = True

    # additive constraint (default), lr at lower resolution
    layer_add = PhysicalConstraintLayer((H, W), "additive")
    out_add = jax.block_until_ready(layer_add(hr, lr_small))
    ref_add = _ref_additive(hr, lr_small).reshape(B, -1, C)
    ok &= out_add.shape == (B, H * W, C)
    ok &= bool(jnp.allclose(out_add, ref_add, atol=1e-5, rtol=1e-5))

    # multiplicative constraint
    layer_mul = PhysicalConstraintLayer((H, W), "multiplicative")
    out_mul = jax.block_until_ready(layer_mul(hr, lr_full))
    ref_mul = _ref_multiplicative(hr, lr_full).reshape(B, -1, C)
    ok &= bool(jnp.allclose(out_mul, ref_mul, atol=1e-5, rtol=1e-5))

    # softmax constraint via the 3D (graph) input path
    hr_graph = hr.reshape(B, H * W, C)      # raw reshape, same as torch .view
    lr_graph = lr_full.reshape(B, H * W, C)
    layer_sm = PhysicalConstraintLayer((H, W), "softmax", exp_factor=1.0)
    out_sm = jax.block_until_ready(layer_sm(hr_graph, lr_graph))
    ref_sm = _ref_softmax(hr, lr_full, 1.0).reshape(B, -1, C)
    ok &= bool(jnp.allclose(out_sm, ref_sm, atol=1e-5, rtol=1e-5))

    if not ok:
        raise SystemExit("mismatch vs pure-JAX reference")
    print("KERNEL_OK")
</pallas_src>

<mosaic_0001>
module attributes {stable_mosaic.version = 11 : i64} {
  func.func @_additive_kernel_fused(%arg0: i32, %arg1: memref<8x256xf32, #tpu.memory_space<vmem>>, %arg2: memref<8x16xf32, #tpu.memory_space<vmem>>, %arg3: memref<16x256xf32, #tpu.memory_space<vmem>>, %arg4: memref<256x256xf32, #tpu.memory_space<vmem>>, %arg5: memref<8x256xf32, #tpu.memory_space<vmem>>) attributes {dimension_semantics = [#tpu.dimension_semantics<parallel>], iteration_bounds = array<i64: 1>, scalar_prefetch = 0 : i64, scratch_operands = 0 : i64, tpu.core_type = #tpu.core_type<tc>, window_params = [{transform_indices = @transform_0, window_bounds = array<i64: 8, 256>}, {transform_indices = @transform_1, window_bounds = array<i64: 8, 16>}, {pipeline_mode = #tpu.pipeline_mode<synchronous>, transform_indices = @transform_2, window_bounds = array<i64: 16, 256>}, {pipeline_mode = #tpu.pipeline_mode<synchronous>, transform_indices = @transform_3, window_bounds = array<i64: 256, 256>}, {transform_indices = @transform_4, window_bounds = array<i64: 8, 256>}]} {
    %c0 = arith.constant 0 : index
    %c0_0 = arith.constant 0 : index
    %0 = vector.load %arg1[%c0, %c0_0] : memref<8x256xf32, #tpu.memory_space<vmem>>, vector<8x256xf32>
    %c0_1 = arith.constant 0 : index
    %c0_2 = arith.constant 0 : index
    %1 = vector.load %arg2[%c0_1, %c0_2] : memref<8x16xf32, #tpu.memory_space<vmem>>, vector<8x16xf32>
    %c0_3 = arith.constant 0 : index
    %c0_4 = arith.constant 0 : index
    %2 = vector.load %arg3[%c0_3, %c0_4] : memref<16x256xf32, #tpu.memory_space<vmem>>, vector<16x256xf32>
    %cst = arith.constant dense<0.000000e+00> : vector<8x256xf32>
    %3 = tpu.matmul %1, %2, %cst {dimension_numbers = #tpu.dot_dimension_numbers<[1], [0], [0], [1], [0, 0, 1, 1], [], []>} : vector<8x16xf32>, vector<16x256xf32>, vector<8x256xf32> -> vector<8x256xf32>
    %c0_5 = arith.constant 0 : index
    %c0_6 = arith.constant 0 : index
    %4 = vector.load %arg4[%c0_5, %c0_6] : memref<256x256xf32, #tpu.memory_space<vmem>>, vector<256x256xf32>
    %cst_7 = arith.constant dense<0.000000e+00> : vector<8x256xf32>
    %5 = tpu.matmul %0, %4, %cst_7 {dimension_numbers = #tpu.dot_dimension_numbers<[1], [0], [0], [1], [0, 0, 1, 1], [], []>} : vector<8x256xf32>, vector<256x256xf32>, vector<8x256xf32> -> vector<8x256xf32>
    %6 = arith.addf %0, %3 : vector<8x256xf32>
    %7 = arith.subf %6, %5 : vector<8x256xf32>
    %c0_8 = arith.constant 0 : index
    %c0_9 = arith.constant 0 : index
    %8 = vector.load %arg5[%c0_8, %c0_9] : memref<8x256xf32, #tpu.memory_space<vmem>>, vector<8x256xf32>
    tpu.vector_store %arg5[%c0_8, %c0_9], %7 {strides = array<i32>} : memref<8x256xf32, #tpu.memory_space<vmem>>, vector<8x256xf32>,
    return
  }
  func.func @transform_0(%arg0: i32) -> (i32, i32) {
    %c0_i32 = arith.constant 0 : i32
    %c0_i32_0 = arith.constant 0 : i32
    return %arg0, %c0_i32 : i32, i32
  }
  func.func @transform_1(%arg0: i32) -> (i32, i32) {
    %c0_i32 = arith.constant 0 : i32
    %c0_i32_0 = arith.constant 0 : i32
    return %arg0, %c0_i32 : i32, i32
  }
  func.func @transform_2(%arg0: i32) -> (i32, i32) {
    %c0_i32 = arith.constant 0 : i32
    %c0_i32_0 = arith.constant 0 : i32
    %c0_i32_1 = arith.constant 0 : i32
    return %c0_i32, %c0_i32_0 : i32, i32
  }
  func.func @transform_3(%arg0: i32) -> (i32, i32) {
    %c0_i32 = arith.constant 0 : i32
    %c0_i32_0 = arith.constant 0 : i32
    %c0_i32_1 = arith.constant 0 : i32
    return %c0_i32, %c0_i32_0 : i32, i32
  }
  func.func @transform_4(%arg0: i32) -> (i32, i32) {
    %c0_i32 = arith.constant 0 : i32
    %c0_i32_0 = arith.constant 0 : i32
    return %arg0, %c0_i32 : i32, i32
  }
}

</mosaic_0001>

<bundles_post_ra>
// kernel: _forward.1
= control target key start
LH: loop header
LB: loop body
LE: loop exit
PB: predicated region body
PF: predicated region fallthrough
CT: control target
= control target key end

     0   :  { %9 = vsyncpa [#allocation3], 0  ;;  %s286_s15 = smov [#allocation2]   ;;  %s349_s0 = inlined_call_operand.vmem [shape: f32[8,256], index: 0, kind: input, shape index: {}]   ;;  %s350_s1 = inlined_call_operand.vmem [shape: f32[8,16], index: 1, kind: input, shape index: {}]   ;;  %s351_s2 = inlined_call_operand.vmem [shape: f32[16,256], index: 2, kind: input, shape index: {}]   ;;  %s352_s3 = inlined_call_operand.hbm [shape: f32[256,256], index: 3, kind: input, shape index: {}]   ;;  %s353_s4 = inlined_call_operand.vmem [shape: f32[8,256], index: 4, kind: output, shape index: {}]  }
   0x1   :  { %s21_s16 = sshll.u32 %s286_s15, 4  ;;  %s22_s16 = int_to_ptr.vmem [resolvable:$true] %s21_s16 }
   0x2   :  { %s272_s17 = scalar_lea.vmem %s22_s16, 8192  ;;  %p277_p1 = scmp.lt.s32.totalorder %s22_s16, %s22_s16 }
   0x3   :  { %p273_p0 = scmp.ne.s32.totalorder %s22_s16, %s272_s17  ;;  %p278_p2 = scmp.lt.s32.totalorder %s272_s17, %s272_s17 }
   0x5   :  { %p279_p3 = por %p278_p2, %p277_p1 }
   0x7   :  { %p280_p4 = pnand %p279_p3, %p273_p0 }
   0x9   :  { %283 = shalt.err (!%p280_p4)
}
   0xa   :  { %s287_s18 = smov 256   ;;  %s288_s19 = smov 16  }
   0xb   :  { %27 = dma.hbm_to_vmem [thread:$0]  %s352_s3, 8192, %s22_s16, [#allocation3], %s287_s18, %s287_s18, %s288_s19  }
   0xc   :  { %284 = dma.done.wait [#allocation3], 8192  }
   0xd   :  { %285 = vsyncadd [#allocation3], 4294959104  ;;  %v289_v0 = vmov 0.0   ;;  %v144_v1 = vld [vmem:[#allocation2 + $0xf8] sm:$0xff]  ;;  %v143_v2 = vld [vmem:[#allocation2 + $0xf0] sm:$0xff]  ;;  %vm38_vm0 = vcmask 130048  }
   0xe   :  { %106 = vmatprep.mubr.f32.mxu0 %v289_v0  ;;  %v142_v3 = vld [vmem:[#allocation2 + $0xe8] sm:$0xff]  ;;  %177 = vmatprep.subr.mxu1 %v144_v1  ;;  %v141_v4 = vld [vmem:[#allocation2 + $0xe0] sm:$0xff]  ;;  %v140_v5 = vld [vmem:[#allocation2 + $0xd8] sm:$0xff] }
   0xf   :  { %178 = vmatpush1.msra.mxu1 %v143_v2  ;;  %v139_v6 = vld [vmem:[#allocation2 + $0xd0] sm:$0xff]  ;;  %v138_v7 = vld [vmem:[#allocation2 + $0xc8] sm:$0xff]  ;;  %v137_v8 = vld [vmem:[#allocation2 + $0xc0] sm:$0xff] }
  0x10   :  { %179 = vmatprep.subr.mxu1 %v142_v3  ;;  %v136_v9 = vld [vmem:[#allocation2 + $0xb8] sm:$0xff]  ;;  %v135_v10 = vld [vmem:[#allocation2 + $0xb0] sm:$0xff]  ;;  %v134_v11 = vld [vmem:[#allocation2 + $0xa8] sm:$0xff] }
  0x11   :  { %180 = vmatpush1.msra.mxu1 %v141_v4  ;;  %v133_v12 = vld [vmem:[#allocation2 + $0xa0] sm:$0xff]  ;;  %v132_v13 = vld [vmem:[#allocation2 + $0x98] sm:$0xff]  ;;  %v131_v14 = vld [vmem:[#allocation2 + $0x90] sm:$0xff] }
  0x12   :  { %181 = vmatprep.subr.mxu1 %v140_v5  ;;  %v130_v15 = vld [vmem:[#allocation2 + $0x88] sm:$0xff]  ;;  %v129_v16 = vld [vmem:[#allocation2 + $0x80] sm:$0xff]  ;;  %v128_v17 = vld [vmem:[#allocation2 + $0x78] sm:$0xff] }
  0x13   :  { %182 = vmatpush1.msra.mxu1 %v139_v6  ;;  %v127_v18 = vld [vmem:[#allocation2 + $0x70] sm:$0xff]  ;;  %v126_v19 = vld [vmem:[#allocation2 + $0x68] sm:$0xff]  ;;  %v125_v20 = vld [vmem:[#allocation2 + $0x60] sm:$0xff] }
  0x14   :  { %183 = vmatprep.subr.mxu1 %v138_v7  ;;  %v124_v21 = vld [vmem:[#allocation2 + $0x58] sm:$0xff]  ;;  %v123_v23 = vld [vmem:[#allocation2 + $0x50] sm:$0xff]  ;;  %v122_v25 = vld [vmem:[#allocation2 + $0x48] sm:$0xff] }
  0x15   :  { %184 = vmatpush1.msra.mxu1 %v137_v8  ;;  %v37_v22 = vld [vmem:[%s351_s2 + $0x18] sm:$0xff]  ;;  %v36_v24 = vld [vmem:[%s351_s2 + $0x10] sm:$0xff]  ;;  %v35_v26 = vld [vmem:[%s351_s2 + $0x8] sm:$0xff] }
  0x16   :  { %185 = vmatprep.subr.mxu1 %v136_v9  ;;  %70 = vmatprep.subr.mxu0 %v37_v22  ;;  %v34_v27 = vld [vmem:[%s351_s2] sm:$0xff]  ;;  %v120_v30 = vld [vmem:[#allocation2 + $0x38] sm:$0xff]  ;;  %v119_v31 = vld [vmem:[#allocation2 + $0x30] sm:$0xff] }
  0x17   :  { %186 = vmatpush1.msra.mxu1 %v135_v10  ;;  %71 = vmatpush1.msra.mxu0 %v36_v24  ;;  %v121_v28 = vld [vmem:[#allocation2 + $0x40] sm:$0xff]  ;;  %v336_v32 = vld [vmem:[%s349_s0 + $0x8] sm:$0xff]  ;;  %v116_v35 = vld [vmem:[#allocation2 + $0x18] sm:$0xff] }
  0x18   :  { %187 = vmatprep.subr.mxu1 %v134_v11  ;;  %72 = vmatprep.subr.mxu0 %v35_v26  ;;  %v33_v29 = vld [vmem:[%s350_s1] sm:$0xff]  ;;  %v118_v33 = vld [vmem:[#allocation2 + $0x28] sm:$0xff]  ;;  %v115_v36 = vld [vmem:[#allocation2 + $0x10] sm:$0xff] }
  0x19   :  { %188 = vmatpush1.msra.mxu1 %v133_v12  ;;  %73 = vmatpush1.msra.mxu0 %v34_v27  ;;  %v117_v34 = vld [vmem:[#allocation2 + $0x20] sm:$0xff]  ;;  %v114_v37 = vld [vmem:[#allocation2 + $0x8] sm:$0xff]  ;;  %v176_v39 = vld [vmem:[#allocation2 + $0x1f8] sm:$0xff] }
  0x1a   :  { %189 = vmatprep.subr.mxu1 %v132_v13  ;;  %259 = vmatmul.mubr.msk.f32.vlgmr.msra.gmra.mxu0 %vm38_vm0, %v33_v29  ;;  %v113_v38 = vld [vmem:[#allocation2] sm:$0xff]  ;;  %v175_v40 = vld [vmem:[#allocation2 + $0x1f0] sm:$0xff]  ;;  %v174_v41 = vld [vmem:[#allocation2 + $0x1e8] sm:$0xff] }
  0x1b   :  { %190 = vmatpush1.msra.mxu1 %v131_v14  ;;  %241 = vmatprep.mubr.f32.mxu1 %v336_v32  ;;  %v173_v42 = vld [vmem:[#allocation2 + $0x1e0] sm:$0xff]  ;;  %v172_v43 = vld [vmem:[#allocation2 + $0x1d8] sm:$0xff]  ;;  %v171_v44 = vld [vmem:[#allocation2 + $0x1d0] sm:$0xff] }
  0x1c   :  { %191 = vmatprep.subr.mxu1 %v130_v15  ;;  %v170_v45 = vld [vmem:[#allocation2 + $0x1c8] sm:$0xff]  ;;  %v169_v46 = vld [vmem:[#allocation2 + $0x1c0] sm:$0xff]  ;;  %v168_v47 = vld [vmem:[#allocation2 + $0x1b8] sm:$0xff] }
  0x1d   :  { %192 = vmatpush1.msra.mxu1 %v129_v16  ;;  %v167_v48 = vld [vmem:[#allocation2 + $0x1b0] sm:$0xff]  ;;  %v166_v49 = vld [vmem:[#allocation2 + $0x1a8] sm:$0xff]  ;;  %v165_v50 = vld [vmem:[#allocation2 + $0x1a0] sm:$0xff] }
  0x1e   :  { %193 = vmatprep.subr.mxu1 %v128_v17  ;;  %v164_v51 = vld [vmem:[#allocation2 + $0x198] sm:$0xff]  ;;  %v163_v52 = vld [vmem:[#allocation2 + $0x190] sm:$0xff]  ;;  %v162_v53 = vld [vmem:[#allocation2 + $0x188] sm:$0xff] }
  0x1f   :  { %194 = vmatpush1.msra.mxu1 %v127_v18  ;;  %v161_v54 = vld [vmem:[#allocation2 + $0x180] sm:$0xff]  ;;  %v160_v55 = vld [vmem:[#allocation2 + $0x178] sm:$0xff]  ;;  %v159_v56 = vld [vmem:[#allocation2 + $0x170] sm:$0xff] }
  0x20   :  { %195 = vmatprep.subr.mxu1 %v126_v19  ;;  %v158_v57 = vld [vmem:[#allocation2 + $0x168] sm:$0xff]  ;;  %v157_v58 = vld [vmem:[#allocation2 + $0x160] sm:$0xff]  ;;  %v156_v59 = vld [vmem:[#allocation2 + $0x158] sm:$0xff] }
  0x21   :  { %196 = vmatpush1.msra.mxu1 %v125_v20  ;;  %v155_v60 = vld [vmem:[#allocation2 + $0x150] sm:$0xff]  ;;  %v154_v61 = vld [vmem:[#allocation2 + $0x148] sm:$0xff]  ;;  %v153_v62 = vld [vmem:[#allocation2 + $0x140] sm:$0xff] }
  0x22   :  { %197 = vmatprep.subr.mxu1 %v124_v21  ;;  %v152_v63 = vld [vmem:[#allocation2 + $0x138] sm:$0xff]  ;;  %v151_v0 = vld [vmem:[#allocation2 + $0x130] sm:$0xff]  ;;  %v150_v1 = vld [vmem:[#allocation2 + $0x128] sm:$0xff] }
  0x23   :  { %198 = vmatpush1.msra.mxu1 %v123_v23  ;;  %v149_v2 = vld [vmem:[#allocation2 + $0x120] sm:$0xff]  ;;  %v148_v3 = vld [vmem:[#allocation2 + $0x118] sm:$0xff]  ;;  %v147_v4 = vld [vmem:[#allocation2 + $0x110] sm:$0xff] }
  0x24   :  { %199 = vmatprep.subr.mxu1 %v122_v25  ;;  %v146_v5 = vld [vmem:[#allocation2 + $0x108] sm:$0xff]  ;;  %v145_v6 = vld [vmem:[#allocation2 + $0x100] sm:$0xff] }
  0x25   :  { %200 = vmatpush1.msra.mxu1 %v121_v28  ;;  %v31_v7 = vld [vmem:[%s349_s0] sm:$0xff] }
  0x26   :  { %201 = vmatprep.subr.mxu1 %v120_v30 }
  0x27   :  { %202 = vmatpush1.msra.mxu1 %v119_v31 }
  0x28   :  { %203 = vmatprep.subr.mxu1 %v118_v33 }
  0x29   :  { %204 = vmatpush1.msra.mxu1 %v117_v34 }
  0x2a   :  { %205 = vmatprep.subr.mxu1 %v116_v35 }
  0x2b   :  { %206 = vmatpush1.msra.mxu1 %v115_v36 }
  0x2c   :  { %207 = vmatprep.subr.mxu1 %v114_v37 }
  0x2d   :  { %208 = vmatpush1.msra.mxu1 %v113_v38 }
  0x2e   :  { %209 = vmatprep.subr.mxu1 %v176_v39 }
  0x2f   :  { %210 = vmatpush2.msra.mxu1 %v175_v40 }
  0x30   :  { %211 = vmatprep.subr.mxu1 %v174_v41 }
  0x31   :  { %212 = vmatpush2.msra.mxu1 %v173_v42 }
  0x32   :  { %213 = vmatprep.subr.mxu1 %v172_v43 }
  0x33   :  { %214 = vmatpush2.msra.mxu1 %v171_v44 }
  0x34   :  { %215 = vmatprep.subr.mxu1 %v170_v45 }
  0x35   :  { %216 = vmatpush2.msra.mxu1 %v169_v46 }
  0x36   :  { %217 = vmatprep.subr.mxu1 %v168_v47 }
  0x37   :  { %218 = vmatpush2.msra.mxu1 %v167_v48 }
  0x38   :  { %219 = vmatprep.subr.mxu1 %v166_v49 }
  0x39   :  { %220 = vmatpush2.msra.mxu1 %v165_v50 }
  0x3a   :  { %221 = vmatprep.subr.mxu1 %v164_v51 }
  0x3b   :  { %222 = vmatpush2.msra.mxu1 %v163_v52 }
  0x3c   :  { %223 = vmatprep.subr.mxu1 %v162_v53 }
  0x3d   :  { %224 = vmatpush2.msra.mxu1 %v161_v54 }
  0x3e   :  { %225 = vmatprep.subr.mxu1 %v160_v55 }
  0x3f   :  { %226 = vmatpush2.msra.mxu1 %v159_v56 }
  0x40   :  { %227 = vmatprep.subr.mxu1 %v158_v57 }
  0x41   :  { %228 = vmatpush2.msra.mxu1 %v157_v58 }
  0x42   :  { %229 = vmatprep.subr.mxu1 %v156_v59 }
  0x43   :  { %230 = vmatpush2.msra.mxu1 %v155_v60 }
  0x44   :  { %231 = vmatprep.subr.mxu1 %v154_v61 }
  0x45   :  { %232 = vmatpush2.msra.mxu1 %v153_v62 }
  0x46   :  { %233 = vmatprep.subr.mxu1 %v152_v63 }
  0x47   :  { %234 = vmatpush2.msra.mxu1 %v151_v0 }
  0x48   :  { %235 = vmatprep.subr.mxu1 %v150_v1 }
  0x49   :  { %236 = vmatpush2.msra.mxu1 %v149_v2 }
  0x4a   :  { %237 = vmatprep.subr.mxu1 %v148_v3 }
  0x4b   :  { %238 = vmatpush2.msra.mxu1 %v147_v4 }
  0x4c   :  { %239 = vmatprep.subr.mxu1 %v146_v5 }
  0x4d   :  { %240 = vmatpush2.msra.mxu1 %v145_v6 }
  0x4e   :  { %242 = vmatmul.mubr.f32.vlgmr.msra.gmra.mxu1 %v31_v7 }
  0xda   :  { %v108_v8 = vpop.f32.mrf.mxu0 }
  0xdb   :  { %v248_v9 = vadd.f32 %v108_v8, %v31_v7 }
  0xdc   :  { %v110_v10 = vpop.f32.mrf.mxu0 }
  0xdd   :  { %v249_v12 = vadd.f32 %v110_v10, %v336_v32 }
 0x10e   :  { %v243_v11 = vpop.f32.mrf.mxu1 }
 0x10f   :  { %v250_v13 = vsub.f32 %v248_v9, %v243_v11 }
 0x110   :  { %v245_v14 = vpop.f32.mrf.mxu1 }
 0x111   :  { %252 = vst [vmem:[%s353_s4] sm:$0xff] %v250_v13  ;;  %v251_v15 = vsub.f32 %v249_v12, %v245_v14 }
 0x113   :  { %253 = vst [vmem:[%s353_s4 + $0x8] sm:$0xff] %v251_v15 }
 0x114   :  { %258 = vsyncpa [#allocation3], 1 }

</bundles_post_ra>
